<compile_context>
chip_gen: v7x
topology: tpu7x:2x2x1
jax: 0.10.0
libtpu: 0.0.40
codegen_flags: <defaults>
</compile_context>

<pallas_src>
import functools
import math

import jax
import jax.numpy as jnp
from jax.experimental import pallas as pl
from jax.experimental.pallas import tpu as pltpu

VMEM_LIMIT_BYTES = 32 * 1024 * 1024
LN_EPS = 1e-12


# ----------------------------------------------------------------------------
# Tiling helper: biggest tile <= target that is aligned and divides dim.
# Falls back to the full dim (always legal: block == full array dim), which
# also avoids any padding / masked stores.
# ----------------------------------------------------------------------------
def _pick_tile(dim, target, align):
    if dim % align != 0:
        return dim
    t = min(target, dim)
    t -= t % align
    while t >= align:
        if dim % t == 0:
            return t
        t -= align
    return dim


# ----------------------------------------------------------------------------
# In-kernel math helpers (VPU / EUP / XLU friendly).
# ----------------------------------------------------------------------------
def _erf_approx(x):
    # Abramowitz & Stegun 7.1.26, |err| <= 1.5e-7.  Uses only exp/mul/add,
    # which lower cleanly in Mosaic.
    # TODO(synk): replace with exact erf if/when lax.erf lowers on this backend.
    a1, a2, a3, a4, a5 = (0.254829592, -0.284496736, 1.421413741,
                          -1.453152027, 1.061405429)
    p = 0.3275911
    ax = jnp.abs(x)
    t = 1.0 / (1.0 + p * ax)
    poly = ((((a5 * t + a4) * t + a3) * t + a2) * t + a1) * t
    y = 1.0 - poly * jnp.exp(-ax * ax)
    return jnp.where(x >= 0, y, -y)


def _gelu(x):
    # gelu(x) = x * 0.5 * (1 + erf(x / sqrt(2)))   (same formula as the module)
    return x * 0.5 * (1.0 + _erf_approx(x * (1.0 / math.sqrt(2.0))))


def _layernorm(x, g, b, eps):
    # Single-pass statistics: mean and E[x^2] reduced together.
    u = jnp.mean(x, axis=-1, keepdims=True)
    m2 = jnp.mean(x * x, axis=-1, keepdims=True)
    var = m2 - u * u
    inv = jax.lax.rsqrt(var + eps)
    return (x - u) * (g * inv) + b


# ----------------------------------------------------------------------------
# Kernel 1: y = act(x @ W + b)        (QKV projection, intermediate, pooler)
# ----------------------------------------------------------------------------
def _linear_act_kernel(x_ref, w_ref, b_ref, o_ref, *, act):
    y = jnp.dot(x_ref[...].astype(jnp.float32),
                w_ref[...].astype(jnp.float32),
                preferred_element_type=jnp.float32)
    y = y + b_ref[...].astype(jnp.float32)
    if act == "gelu":
        y = _gelu(y)
    elif act == "tanh":
        y = jnp.tanh(y)
    o_ref[...] = y.astype(o_ref.dtype)


def linear_act(x2d, w, b, act="none", *, row_tile=256, col_tile=512):
    M, K = x2d.shape
    _, N = w.shape
    tm = _pick_tile(M, row_tile, 8)
    tn = _pick_tile(N, col_tile, 128)
    b2d = b.reshape(1, N)
    return pl.pallas_call(
        functools.partial(_linear_act_kernel, act=act),
        out_shape=jax.ShapeDtypeStruct((M, N), x2d.dtype),
        grid_spec=pltpu.PrefetchScalarGridSpec(
            num_scalar_prefetch=0,
            grid=(M // tm, N // tn),
            in_specs=[
                pl.BlockSpec((tm, K), lambda i, j: (i, 0)),
                pl.BlockSpec((K, tn), lambda i, j: (0, j)),
                pl.BlockSpec((1, tn), lambda i, j: (0, j)),
            ],
            out_specs=pl.BlockSpec((tm, tn), lambda i, j: (i, j)),
        ),
        compiler_params=pltpu.CompilerParams(
            dimension_semantics=("parallel", "parallel"),
            vmem_limit_bytes=VMEM_LIMIT_BYTES,
        ),
    )(x2d, w, b2d)


# ----------------------------------------------------------------------------
# Kernel 2: y = LayerNorm(x @ W + b + residual)   (BERTSelfOutput / BERTOutput)
# Fuses the dense, bias, residual add and LayerNorm in one HBM pass.
# ----------------------------------------------------------------------------
def _linear_res_ln_kernel(x_ref, w_ref, b_ref, r_ref, g_ref, be_ref, o_ref, *, eps):
    y = jnp.dot(x_ref[...].astype(jnp.float32),
                w_ref[...].astype(jnp.float32),
                preferred_element_type=jnp.float32)
    y = y + b_ref[...].astype(jnp.float32) + r_ref[...].astype(jnp.float32)
    o_ref[...] = _layernorm(y, g_ref[...].astype(jnp.float32),
                            be_ref[...].astype(jnp.float32), eps).astype(o_ref.dtype)


def linear_residual_layernorm(x2d, w, b, res2d, gamma, beta, *,
                              eps=LN_EPS, row_tile=256):
    M, K = x2d.shape
    _, H = w.shape
    tm = _pick_tile(M, row_tile, 8)
    b2d = b.reshape(1, H)
    g2d = gamma.reshape(1, H)
    be2d = beta.reshape(1, H)
    return pl.pallas_call(
        functools.partial(_linear_res_ln_kernel, eps=eps),
        out_shape=jax.ShapeDtypeStruct((M, H), x2d.dtype),
        grid_spec=pltpu.PrefetchScalarGridSpec(
            num_scalar_prefetch=0,
            grid=(M // tm,),
            in_specs=[
                pl.BlockSpec((tm, K), lambda i: (i, 0)),
                pl.BlockSpec((K, H), lambda i: (0, 0)),
                pl.BlockSpec((1, H), lambda i: (0, 0)),
                pl.BlockSpec((tm, H), lambda i: (i, 0)),
                pl.BlockSpec((1, H), lambda i: (0, 0)),
                pl.BlockSpec((1, H), lambda i: (0, 0)),
            ],
            out_specs=pl.BlockSpec((tm, H), lambda i: (i, 0)),
        ),
        compiler_params=pltpu.CompilerParams(
            dimension_semantics=("parallel",),
            vmem_limit_bytes=VMEM_LIMIT_BYTES,
        ),
    )(x2d, w, b2d, res2d, g2d, be2d)


# ----------------------------------------------------------------------------
# Kernel 3: embeddings: LayerNorm(word + position + token_type)
# ----------------------------------------------------------------------------
def _add3_ln_kernel(a_ref, b_ref, c_ref, g_ref, be_ref, o_ref, *, eps):
    x = (a_ref[...].astype(jnp.float32) + b_ref[...].astype(jnp.float32)
         + c_ref[...].astype(jnp.float32))
    o_ref[...] = _layernorm(x, g_ref[...].astype(jnp.float32),
                            be_ref[...].astype(jnp.float32), eps).astype(o_ref.dtype)


def add3_layernorm(a, b, c, gamma, beta, *, eps=LN_EPS, row_tile=256):
    M, H = a.shape
    tm = _pick_tile(M, row_tile, 8)
    g2d = gamma.reshape(1, H)
    be2d = beta.reshape(1, H)
    return pl.pallas_call(
        functools.partial(_add3_ln_kernel, eps=eps),
        out_shape=jax.ShapeDtypeStruct((M, H), a.dtype),
        grid_spec=pltpu.PrefetchScalarGridSpec(
            num_scalar_prefetch=0,
            grid=(M // tm,),
            in_specs=[
                pl.BlockSpec((tm, H), lambda i: (i, 0)),
                pl.BlockSpec((tm, H), lambda i: (i, 0)),
                pl.BlockSpec((tm, H), lambda i: (i, 0)),
                pl.BlockSpec((1, H), lambda i: (0, 0)),
                pl.BlockSpec((1, H), lambda i: (0, 0)),
            ],
            out_specs=pl.BlockSpec((tm, H), lambda i: (i, 0)),
        ),
        compiler_params=pltpu.CompilerParams(
            dimension_semantics=("parallel",),
            vmem_limit_bytes=VMEM_LIMIT_BYTES,
        ),
    )(a, b, c, g2d, be2d)


# ----------------------------------------------------------------------------
# Kernel 4: per-(batch, head) self attention
#   out = softmax(Q K^T * scale + mask) @ V
# ----------------------------------------------------------------------------
def _attn_kernel(q_ref, k_ref, v_ref, m_ref, o_ref, *, scale):
    q = q_ref[0].astype(jnp.float32)      # (S, dh)
    k = k_ref[0].astype(jnp.float32)      # (S, dh)
    v = v_ref[0].astype(jnp.float32)      # (S, dh)
    m = m_ref[0].astype(jnp.float32)      # (1, S) additive mask
    s = jax.lax.dot_general(q, k, (((1,), (1,)), ((), ())),
                            preferred_element_type=jnp.float32) * scale + m
    s_max = jnp.max(s, axis=-1, keepdims=True)
    p = jnp.exp(s - s_max)
    p = p / jnp.sum(p, axis=-1, keepdims=True)
    # TODO(synk): attention_probs dropout omitted (inference semantics).
    o = jnp.dot(p, v, preferred_element_type=jnp.float32)
    o_ref[0] = o.astype(o_ref.dtype)


def attention(qh, kh, vh, mask_add, *, scale):
    G, S, dh = qh.shape
    return pl.pallas_call(
        functools.partial(_attn_kernel, scale=scale),
        out_shape=jax.ShapeDtypeStruct((G, S, dh), qh.dtype),
        grid_spec=pltpu.PrefetchScalarGridSpec(
            num_scalar_prefetch=0,
            grid=(G,),
            in_specs=[
                pl.BlockSpec((1, S, dh), lambda g: (g, 0, 0)),
                pl.BlockSpec((1, S, dh), lambda g: (g, 0, 0)),
                pl.BlockSpec((1, S, dh), lambda g: (g, 0, 0)),
                pl.BlockSpec((1, 1, S), lambda g: (g, 0, 0)),
            ],
            out_specs=pl.BlockSpec((1, S, dh), lambda g: (g, 0, 0)),
        ),
        compiler_params=pltpu.CompilerParams(
            dimension_semantics=("parallel",),
            vmem_limit_bytes=VMEM_LIMIT_BYTES,
        ),
    )(qh, kh, vh, mask_add)


# ----------------------------------------------------------------------------
# Full BertModel forward (Pallas kernels + light XLA glue for gathers/reshapes)
# ----------------------------------------------------------------------------
def bert_model_forward(params, input_ids, token_type_ids=None,
                       attention_mask=None, *, num_heads):
    B, S = input_ids.shape
    H = params["word_emb"].shape[1]
    dh = H // num_heads

    if attention_mask is None:
        attention_mask = jnp.ones_like(input_ids)
    if token_type_ids is None:
        token_type_ids = jnp.zeros_like(input_ids)

    # extended attention mask: (1 - mask) * -1e6, broadcast per (batch, head)
    ext = (1.0 - attention_mask.astype(jnp.float32)) * -1000000.0      # (B, S)
    mask_bh = jnp.broadcast_to(ext[:, None, None, :],
                               (B, num_heads, 1, S)).reshape(B * num_heads, 1, S)

    # --- Embeddings -------------------------------------------------------
    # TODO(synk): embedding gathers done with jnp.take in XLA (data-dependent
    # DMA gather in Pallas would need scalar-prefetch index_maps).
    pos_ids = jnp.broadcast_to(jnp.arange(S, dtype=input_ids.dtype)[None, :], (B, S))
    words = jnp.take(params["word_emb"], input_ids.reshape(-1), axis=0)
    pos = jnp.take(params["pos_emb"], pos_ids.reshape(-1), axis=0)
    types = jnp.take(params["type_emb"], token_type_ids.reshape(-1), axis=0)
    h2d = add3_layernorm(words, pos, types, params["emb_gamma"], params["emb_beta"])
    # TODO(synk): hidden dropout omitted (inference semantics).

    def to_heads(t):
        return (t.reshape(B, S, num_heads, dh)
                 .transpose(0, 2, 1, 3)
                 .reshape(B * num_heads, S, dh))

    all_layers = []
    for lp in params["layers"]:
        x2d = h2d
        # fused QKV projection (one matmul over the concatenated weight)
        qkv = linear_act(x2d, lp["w_qkv"], lp["b_qkv"], act="none")
        q, k, v = jnp.split(qkv, 3, axis=-1)
        ctx = attention(to_heads(q), to_heads(k), to_heads(v), mask_bh,
                        scale=1.0 / math.sqrt(dh))
        ctx2d = (ctx.reshape(B, num_heads, S, dh)
                    .transpose(0, 2, 1, 3)
                    .reshape(B * S, H))
        # BERTSelfOutput: dense + residual + LayerNorm fused
        attn_out = linear_residual_layernorm(ctx2d, lp["w_ao"], lp["b_ao"],
                                             x2d, lp["g_ao"], lp["be_ao"])
        # BERTIntermediate: dense + gelu fused
        inter = linear_act(attn_out, lp["w_i"], lp["b_i"], act="gelu")
        # BERTOutput: dense + residual + LayerNorm fused
        h2d = linear_residual_layernorm(inter, lp["w_o"], lp["b_o"],
                                        attn_out, lp["g_o"], lp["be_o"])
        all_layers.append(h2d.reshape(B, S, H))

    # Pooler: dense(first token) + tanh
    first_tok = all_layers[-1][:, 0, :]
    pooled = linear_act(first_tok, params["w_pool"], params["b_pool"], act="tanh")
    return all_layers, pooled


# ----------------------------------------------------------------------------
# Plain-JAX reference (mirrors the PyTorch math exactly, incl. exact erf gelu)
# ----------------------------------------------------------------------------
def _ref_layernorm(x, g, b, eps=LN_EPS):
    u = jnp.mean(x, axis=-1, keepdims=True)
    s = jnp.mean((x - u) ** 2, axis=-1, keepdims=True)
    return g * ((x - u) / jnp.sqrt(s + eps)) + b


def _ref_gelu(x):
    return x * 0.5 * (1.0 + jax.scipy.special.erf(x / math.sqrt(2.0)))


def ref_bert_forward(params, input_ids, token_type_ids, attention_mask, *, num_heads):
    B, S = input_ids.shape
    H = params["word_emb"].shape[1]
    dh = H // num_heads
    ext = (1.0 - attention_mask.astype(jnp.float32))[:, None, None, :] * -1000000.0
    pos_ids = jnp.broadcast_to(jnp.arange(S)[None, :], (B, S))
    emb = (params["word_emb"][input_ids] + params["pos_emb"][pos_ids]
           + params["type_emb"][token_type_ids])
    h = _ref_layernorm(emb, params["emb_gamma"], params["emb_beta"])
    all_layers = []
    for lp in params["layers"]:
        x = h
        qkv = x @ lp["w_qkv"] + lp["b_qkv"]
        q, k, v = jnp.split(qkv, 3, axis=-1)

        def heads(t):
            return t.reshape(B, S, num_heads, dh).transpose(0, 2, 1, 3)

        qh, kh, vh = heads(q), heads(k), heads(v)
        scores = jnp.einsum("bhqd,bhkd->bhqk", qh, kh) / math.sqrt(dh) + ext
        probs = jax.nn.softmax(scores, axis=-1)
        ctx = (jnp.einsum("bhqk,bhkd->bhqd", probs, vh)
                  .transpose(0, 2, 1, 3).reshape(B, S, H))
        attn_out = _ref_layernorm(ctx @ lp["w_ao"] + lp["b_ao"] + x,
                                  lp["g_ao"], lp["be_ao"])
        inter = _ref_gelu(attn_out @ lp["w_i"] + lp["b_i"])
        h = _ref_layernorm(inter @ lp["w_o"] + lp["b_o"] + attn_out,
                           lp["g_o"], lp["be_o"])
        all_layers.append(h)
    pooled = jnp.tanh(all_layers[-1][:, 0] @ params["w_pool"] + params["b_pool"])
    return all_layers, pooled


# ----------------------------------------------------------------------------
# Parameter init (deterministic, weights stored as [in, out] = torch W.T)
# ----------------------------------------------------------------------------
def init_bert_params(key, *, vocab, hidden, layers, intermediate,
                     max_pos, type_vocab):
    std = 0.02
    keys = jax.random.split(key, 5 + layers)
    n = lambda k, shape: jax.random.normal(k, shape, jnp.float32) * std
    params = {
        "word_emb": n(keys[0], (vocab, hidden)),
        "pos_emb": n(keys[1], (max_pos, hidden)),
        "type_emb": n(keys[2], (type_vocab, hidden)),
        "emb_gamma": jnp.ones((hidden,), jnp.float32) + n(keys[3], (hidden,)),
        "emb_beta": n(keys[4], (hidden,)),
        "layers": [],
    }
    for li in range(layers):
        lk = jax.random.split(jax.random.fold_in(key, 100 + li), 10)
        params["layers"].append({
            "w_qkv": n(lk[0], (hidden, 3 * hidden)),
            "b_qkv": n(lk[1], (3 * hidden,)),
            "w_ao": n(lk[2], (hidden, hidden)),
            "b_ao": n(lk[3], (hidden,)),
            "g_ao": jnp.ones((hidden,), jnp.float32) + n(lk[4], (hidden,)),
            "be_ao": n(lk[5], (hidden,)),
            "w_i": n(lk[6], (hidden, intermediate)),
            "b_i": n(lk[7], (intermediate,)),
            "w_o": n(lk[8], (intermediate, hidden)),
            "b_o": n(lk[9], (hidden,)),
            "g_o": jnp.ones((hidden,), jnp.float32),
            "be_o": jnp.zeros((hidden,), jnp.float32),
        })
    pk = jax.random.split(jax.random.fold_in(key, 999), 2)
    params["w_pool"] = n(pk[0], (hidden, hidden))
    params["b_pool"] = n(pk[1], (hidden,))
    return params


if __name__ == "__main__":
    key = jax.random.PRNGKey(0)

    # Small BertConfig-like setup
    vocab, hidden, num_layers, num_heads = 64, 32, 2, 2
    intermediate, max_pos, type_vocab = 64, 16, 2
    batch, seq = 2, 8

    kp, ki, kt = jax.random.split(key, 3)
    params = init_bert_params(kp, vocab=vocab, hidden=hidden, layers=num_layers,
                              intermediate=intermediate, max_pos=max_pos,
                              type_vocab=type_vocab)

    input_ids = jax.random.randint(ki, (batch, seq), 0, vocab, dtype=jnp.int32)
    token_type_ids = jax.random.randint(kt, (batch, seq), 0, type_vocab, dtype=jnp.int32)
    attention_mask = jnp.array([[1, 1, 1, 1, 1, 1, 1, 1],
                                [1, 1, 1, 1, 1, 1, 0, 0]], dtype=jnp.int32)

    all_layers, pooled = bert_model_forward(params, input_ids, token_type_ids,
                                            attention_mask, num_heads=num_heads)
    pooled = jax.block_until_ready(pooled)
    seq_out = jax.block_until_ready(all_layers[-1])

    ref_layers, ref_pooled = ref_bert_forward(params, input_ids, token_type_ids,
                                              attention_mask, num_heads=num_heads)

    assert jnp.allclose(seq_out, ref_layers[-1], atol=1e-4, rtol=1e-4), \
        "sequence_output mismatch vs reference"
    assert jnp.allclose(pooled, ref_pooled, atol=1e-4, rtol=1e-4), \
        "pooled_output mismatch vs reference"

    print("KERNEL_OK")
</pallas_src>

<mosaic_0001>
module attributes {stable_mosaic.version = 11 : i64} {
  func.func @_add3_ln_kernel(%arg0: i32, %arg1: memref<16x32xf32, #tpu.memory_space<vmem>>, %arg2: memref<16x32xf32, #tpu.memory_space<vmem>>, %arg3: memref<16x32xf32, #tpu.memory_space<vmem>>, %arg4: memref<1x32xf32, #tpu.memory_space<vmem>>, %arg5: memref<1x32xf32, #tpu.memory_space<vmem>>, %arg6: memref<16x32xf32, #tpu.memory_space<vmem>>) attributes {dimension_semantics = [#tpu.dimension_semantics<parallel>], iteration_bounds = array<i64: 1>, scalar_prefetch = 0 : i64, scratch_operands = 0 : i64, tpu.core_type = #tpu.core_type<tc>, window_params = [{transform_indices = @transform_0, window_bounds = array<i64: 16, 32>}, {transform_indices = @transform_1, window_bounds = array<i64: 16, 32>}, {transform_indices = @transform_2, window_bounds = array<i64: 16, 32>}, {pipeline_mode = #tpu.pipeline_mode<synchronous>, transform_indices = @transform_3, window_bounds = array<i64: 1, 32>}, {pipeline_mode = #tpu.pipeline_mode<synchronous>, transform_indices = @transform_4, window_bounds = array<i64: 1, 32>}, {transform_indices = @transform_5, window_bounds = array<i64: 16, 32>}]} {
    %c0 = arith.constant 0 : index
    %c0_0 = arith.constant 0 : index
    %0 = vector.load %arg1[%c0, %c0_0] : memref<16x32xf32, #tpu.memory_space<vmem>>, vector<16x32xf32>
    %c0_1 = arith.constant 0 : index
    %c0_2 = arith.constant 0 : index
    %1 = vector.load %arg2[%c0_1, %c0_2] : memref<16x32xf32, #tpu.memory_space<vmem>>, vector<16x32xf32>
    %2 = arith.addf %0, %1 : vector<16x32xf32>
    %c0_3 = arith.constant 0 : index
    %c0_4 = arith.constant 0 : index
    %3 = vector.load %arg3[%c0_3, %c0_4] : memref<16x32xf32, #tpu.memory_space<vmem>>, vector<16x32xf32>
    %4 = arith.addf %2, %3 : vector<16x32xf32>
    %c0_5 = arith.constant 0 : index
    %c0_6 = arith.constant 0 : index
    %5 = vector.load %arg4[%c0_5, %c0_6] : memref<1x32xf32, #tpu.memory_space<vmem>>, vector<1x32xf32>
    %c0_7 = arith.constant 0 : index
    %c0_8 = arith.constant 0 : index
    %6 = vector.load %arg5[%c0_7, %c0_8] : memref<1x32xf32, #tpu.memory_space<vmem>>, vector<1x32xf32>
    %cst = arith.constant dense<0.000000e+00> : vector<16xf32>
    %7 = vector.multi_reduction <add>, %4, %cst [1] : vector<16x32xf32> to vector<16xf32>
    %8 = vector.shape_cast %7 : vector<16xf32> to vector<16x1xf32>
    %cst_9 = arith.constant 3.200000e+01 : f32
    %9 = vector.broadcast %cst_9 : f32 to vector<16x1xf32>
    %10 = arith.divf %8, %9 : vector<16x1xf32>
    %11 = arith.mulf %4, %4 : vector<16x32xf32>
    %cst_10 = arith.constant dense<0.000000e+00> : vector<16xf32>
    %12 = vector.multi_reduction <add>, %11, %cst_10 [1] : vector<16x32xf32> to vector<16xf32>
    %13 = vector.shape_cast %12 : vector<16xf32> to vector<16x1xf32>
    %cst_11 = arith.constant 3.200000e+01 : f32
    %14 = vector.broadcast %cst_11 : f32 to vector<16x1xf32>
    %15 = arith.divf %13, %14 : vector<16x1xf32>
    %16 = arith.mulf %10, %10 : vector<16x1xf32>
    %17 = arith.subf %15, %16 : vector<16x1xf32>
    %cst_12 = arith.constant 9.99999996E-13 : f32
    %18 = vector.broadcast %cst_12 : f32 to vector<16x1xf32>
    %19 = arith.addf %17, %18 : vector<16x1xf32>
    %20 = math.rsqrt %19 : vector<16x1xf32>
    %21 = vector.broadcast %10 : vector<16x1xf32> to vector<16x32xf32>
    %22 = arith.subf %4, %21 : vector<16x32xf32>
    %23 = vector.broadcast %5 : vector<1x32xf32> to vector<16x32xf32>
    %24 = vector.broadcast %20 : vector<16x1xf32> to vector<16x32xf32>
    %25 = arith.mulf %23, %24 : vector<16x32xf32>
    %26 = arith.mulf %22, %25 : vector<16x32xf32>
    %27 = vector.broadcast %6 : vector<1x32xf32> to vector<16x32xf32>
    %28 = arith.addf %26, %27 : vector<16x32xf32>
    %c0_13 = arith.constant 0 : index
    %c0_14 = arith.constant 0 : index
    %29 = vector.load %arg6[%c0_13, %c0_14] : memref<16x32xf32, #tpu.memory_space<vmem>>, vector<16x32xf32>
    tpu.vector_store %arg6[%c0_13, %c0_14], %28 {strides = array<i32>} : memref<16x32xf32, #tpu.memory_space<vmem>>, vector<16x32xf32>,
    return
  }
  func.func @transform_0(%arg0: i32) -> (i32, i32) {
    %c0_i32 = arith.constant 0 : i32
    %c0_i32_0 = arith.constant 0 : i32
    return %arg0, %c0_i32 : i32, i32
  }
  func.func @transform_1(%arg0: i32) -> (i32, i32) {
    %c0_i32 = arith.constant 0 : i32
    %c0_i32_0 = arith.constant 0 : i32
    return %arg0, %c0_i32 : i32, i32
  }
  func.func @transform_2(%arg0: i32) -> (i32, i32) {
    %c0_i32 = arith.constant 0 : i32
    %c0_i32_0 = arith.constant 0 : i32
    return %arg0, %c0_i32 : i32, i32
  }
  func.func @transform_3(%arg0: i32) -> (i32, i32) {
    %c0_i32 = arith.constant 0 : i32
    %c0_i32_0 = arith.constant 0 : i32
    %c0_i32_1 = arith.constant 0 : i32
    return %c0_i32, %c0_i32_0 : i32, i32
  }
  func.func @transform_4(%arg0: i32) -> (i32, i32) {
    %c0_i32 = arith.constant 0 : i32
    %c0_i32_0 = arith.constant 0 : i32
    %c0_i32_1 = arith.constant 0 : i32
    return %c0_i32, %c0_i32_0 : i32, i32
  }
  func.func @transform_5(%arg0: i32) -> (i32, i32) {
    %c0_i32 = arith.constant 0 : i32
    %c0_i32_0 = arith.constant 0 : i32
    return %arg0, %c0_i32 : i32, i32
  }
}

</mosaic_0001>

<bundles_post_ra>
// kernel: tpu_custom_call.1
= control target key start
LH: loop header
LB: loop body
LE: loop exit
PB: predicated region body
PF: predicated region fallthrough
CT: control target
= control target key end

     0   :  { %10 = vsyncpa [#allocation3], 0  ;;  %s363_s0 = inlined_call_operand.hbm [shape: f32[16,32], index: 0, kind: input, shape index: {}]   ;;  %s364_s1 = inlined_call_operand.hbm [shape: f32[16,32], index: 1, kind: input, shape index: {}]   ;;  %s365_s2 = inlined_call_operand.hbm [shape: f32[16,32], index: 2, kind: input, shape index: {}]   ;;  %s366_s3 = inlined_call_operand.vmem [shape: f32[1,32], index: 3, kind: input, shape index: {}]   ;;  %s367_s4 = inlined_call_operand.vmem [shape: f32[1,32], index: 4, kind: input, shape index: {}]   ;;  %s368_s5 = inlined_call_operand.hbm [shape: f32[16,32], index: 5, kind: output, shape index: {}]  }
   0x1   :  { %11 = vsyncpa [#allocation6], 0 }
   0x2   :  { %12 = vsyncpa [#allocation4], 0  ;;  %s248_s18 = smov [#allocation5]   ;;  %s249_s20 = smov [#allocation2]  }
   0x3   :  { %s30_s19 = sshll.u32 %s248_s18, 4  ;;  %s18_s21 = sshll.u32 %s249_s20, 4  ;;  %s31_s19 = int_to_ptr.vmem [resolvable:$true] %s30_s19  ;;  %s284_s21 = int_to_ptr.vmem [resolvable:$true] %s18_s21 }
   0x4   :  { %s154_s24 = scalar_lea.hbm %s364_s1, 256 }
   0x5   :  { %p155_p0 = scmp.ne.s32.totalorder %s364_s1, %s154_s24  ;;  %p158_p1 = scmp.lt.u32.totalorder %s154_s24, %s364_s1 }
   0x7   :  { %p160_p2 = pnand %p158_p1, %p155_p0 }
   0x9   :  { %163 = shalt.err (!%p160_p2)
}
   0xa   :  { %s164_s29 = scalar_lea.vmem %s31_s19, 256  ;;  %p169_p4 = scmp.lt.s32.totalorder %s31_s19, %s31_s19 }
   0xb   :  { %p165_p3 = scmp.ne.s32.totalorder %s31_s19, %s164_s29  ;;  %p170_p5 = scmp.lt.s32.totalorder %s164_s29, %s164_s29 }
   0xd   :  { %p171_p6 = por %p170_p5, %p169_p4 }
   0xf   :  { %p172_p7 = pnand %p171_p6, %p165_p3 }
  0x11   :  { %175 = shalt.err (!%p172_p7)
}
  0x12   :  { %s250_s30 = smov 128   ;;  %s251_s6 = smov 8  }
  0x13   :  { %36 = dma.hbm_to_vmem [thread:$0]  %s364_s1, 256, %s31_s19, [#allocation6], %s250_s30, %s250_s30, %s251_s6  }
  0x14   :  { %s176_s11 = scalar_lea.hbm %s363_s0, 256 }
  0x15   :  { %p177_p8 = scmp.ne.s32.totalorder %s363_s0, %s176_s11  ;;  %p180_p9 = scmp.lt.u32.totalorder %s176_s11, %s363_s0 }
  0x17   :  { %p182_p10 = pnand %p180_p9, %p177_p8 }
  0x19   :  { %185 = shalt.err (!%p182_p10)
}
  0x1a   :  { %s186_s16 = scalar_lea.vmem %s284_s21, 256  ;;  %p191_p12 = scmp.lt.s32.totalorder %s284_s21, %s284_s21 }
  0x1b   :  { %p187_p11 = scmp.ne.s32.totalorder %s284_s21, %s186_s16  ;;  %p192_p13 = scmp.lt.s32.totalorder %s186_s16, %s186_s16 }
  0x1d   :  { %p193_p0 = por %p192_p13, %p191_p12 }
  0x1f   :  { %p194_p1 = pnand %p193_p0, %p187_p11 }
  0x21   :  { %197 = shalt.err (!%p194_p1)
}
  0x22   :  { %24 = dma.hbm_to_vmem [thread:$0]  %s363_s0, 256, %s284_s21, [#allocation3], %s250_s30, %s250_s30, %s251_s6  }
  0x23   :  { %s252_s18 = smov [#allocation7]   ;;  %s198_s23 = scalar_lea.hbm %s365_s2, 256 }
  0x24   :  { %s42_s19 = sshll.u32 %s252_s18, 4  ;;  %p199_p2 = scmp.ne.s32.totalorder %s365_s2, %s198_s23  ;;  %s43_s19 = int_to_ptr.vmem [resolvable:$true] %s42_s19 }
  0x25   :  { %p202_p3 = scmp.lt.u32.totalorder %s198_s23, %s365_s2 }
  0x27   :  { %p204_p4 = pnand %p202_p3, %p199_p2 }
  0x29   :  { %207 = shalt.err (!%p204_p4)
}
  0x2a   :  { %s208_s28 = scalar_lea.vmem %s43_s19, 256  ;;  %p213_p6 = scmp.lt.s32.totalorder %s43_s19, %s43_s19 }
  0x2b   :  { %p209_p5 = scmp.ne.s32.totalorder %s43_s19, %s208_s28  ;;  %p214_p7 = scmp.lt.s32.totalorder %s208_s28, %s208_s28 }
  0x2d   :  { %p215_p8 = por %p214_p7, %p213_p6 }
  0x2f   :  { %p216_p9 = pnand %p215_p8, %p209_p5 }
  0x31   :  { %219 = shalt.err (!%p216_p9)
}
  0x32   :  { %48 = dma.hbm_to_vmem [thread:$0]  %s365_s2, 256, %s43_s19, [#allocation6], %s250_s30, %s250_s30, %s251_s6  }
  0x33   :  { %242 = dma.done.wait [#allocation3], 256  }
  0x34   :  { %243 = vsyncadd [#allocation3], 4294967040 }
  0x35   :  { %244 = dma.done.wait [#allocation6], 512  }
  0x36   :  { %245 = vsyncadd [#allocation6], 4294966784  ;;  %v62_v0 = vld [vmem:[#allocation2] sm:$0xff]  ;;  %v64_v1 = vld [vmem:[#allocation5] sm:$0xff]  ;;  %vm74_vm0 = vcmask 261120   ;;  %s253_s9 = smov [#allocation8]  }
  0x37   :  { %v68_v2 = vld [vmem:[#allocation7] sm:$0xff]  ;;  %v66_v3 = vadd.f32 %v64_v1, %v62_v0  ;;  %v63_v4 = vld [vmem:[#allocation2 + $0x8] sm:$0xff]  ;;  %v65_v5 = vld [vmem:[#allocation5 + $0x8] sm:$0xff]  ;;  %s129_s10 = sshll.u32 %s253_s9, 4  ;;  %s130_s10 = int_to_ptr.vmem [resolvable:$true] %s129_s10 }
  0x38   :  { %v69_v6 = vld [vmem:[#allocation7 + $0x8] sm:$0xff]  ;;  %v67_v7 = vadd.f32 %v65_v5, %v63_v4  ;;  %v142_v30 = vld [vmem:[%s366_s3] ss:$0 sm:$0xff]  ;;  %s220_s3 = scalar_lea.vmem %s130_s10, 256  ;;  %p225_p11 = scmp.lt.s32.totalorder %s130_s10, %s130_s10 }
  0x39   :  { %v70_v8 = vadd.f32 %v68_v2, %v66_v3  ;;  %v143_v34 = vld [vmem:[%s367_s4] ss:$0 sm:$0xff]  ;;  %p221_p10 = scmp.ne.s32.totalorder %s130_s10, %s220_s3  ;;  %p226_p12 = scmp.lt.s32.totalorder %s220_s3, %s220_s3 }
  0x3a   :  { %v71_v9 = vadd.f32 %v69_v6, %v67_v7 }
  0x3b   :  { %v75_v10 = vsel %vm74_vm0, %v70_v8, 0.0  ;;  %v84_v11 = vmul.f32 %v70_v8, %v70_v8  ;;  %p227_p13 = por %p226_p12, %p225_p11 }
  0x3c   :  { %76 = vadd.xlane.f32.xlu0 %v75_v10  ;;  %v85_v12 = vmul.f32 %v71_v9, %v71_v9  ;;  %v78_v14 = vsel %vm74_vm0, %v71_v9, 0.0 }
  0x3d   :  { %v86_v13 = vsel %vm74_vm0, %v84_v11, 0.0  ;;  %p228_p0 = pnand %p227_p13, %p221_p10 }
  0x3e   :  { %87 = vadd.xlane.f32.xlu1 %v86_v13  ;;  %v89_v15 = vsel %vm74_vm0, %v85_v12, 0.0 }
  0x40   :  { %79 = vadd.xlane.f32.xlu0 %v78_v14 }
  0x42   :  { %90 = vadd.xlane.f32.xlu1 %v89_v15 }
  0xc9   :  { %v77_v16 = vpop.xlane.xlu0 %76 }
  0xca   :  { %v82_v17 = vmul.f32 0.03125, %v77_v16 }
  0xcb   :  { %v88_v18 = vpop.xlane.xlu1 %87 }
  0xcc   :  { %v94_v19 = vmul.f32 %v82_v17, %v82_v17  ;;  %v92_v20 = vmul.f32 0.03125, %v88_v18  ;;  %v102_v32 = vsub.f32 %v70_v8, %v82_v17 }
  0xcd   :  { %v80_v21 = vpop.xlane.xlu0 %79 }
  0xce   :  { %v96_v22 = vsub.f32 %v92_v20, %v94_v19  ;;  %v83_v23 = vmul.f32 0.03125, %v80_v21 }
  0xcf   :  { %v91_v24 = vpop.xlane.xlu1 %90 }
  0xd0   :  { %v98_v25 = vadd.f32 1e-12, %v96_v22  ;;  %v95_v26 = vmul.f32 %v83_v23, %v83_v23  ;;  %v93_v27 = vmul.f32 0.03125, %v91_v24  ;;  %v103_v37 = vsub.f32 %v71_v9, %v83_v23 }
  0xd2   :  { %150 = vrsqrt.f32 %v98_v25  ;;  %v97_v28 = vsub.f32 %v93_v27, %v95_v26 }
  0xd4   :  { %v99_v29 = vadd.f32 1e-12, %v97_v28 }
  0xd6   :  { %152 = vrsqrt.f32 %v99_v29 }
  0xdc   :  { %v151_v31 = vpop.eup %150 }
  0xdd   :  { %v110_v33 = vmul.f32 %v151_v31, %v142_v30 }
  0xdf   :  { %v112_v35 = vmul.f32 %v110_v33, %v102_v32 }
  0xe0   :  { %v153_v36 = vpop.eup %152 }
  0xe1   :  { %v111_v38 = vmul.f32 %v153_v36, %v142_v30  ;;  %v120_v39 = vadd.f32 %v143_v34, %v112_v35 }
  0xe3   :  { %v113_v40 = vmul.f32 %v111_v38, %v103_v37  ;;  %122 = vst.msk [vmem:[#allocation8] sm:$0xff] %vm74_vm0, %v120_v39 }
  0xe5   :  { %v121_v41 = vadd.f32 %v143_v34, %v113_v40 }
  0xe7   :  { %123 = vst.msk [vmem:[#allocation8 + $0x8] sm:$0xff] %vm74_vm0, %v121_v41 }
  0xe8   :  { %231 = shalt.err (!%p228_p0)
}
  0xe9   :  { %s232_s12 = scalar_lea.hbm %s368_s5, 256 }
  0xea   :  { %p233_p1 = scmp.ne.s32.totalorder %s368_s5, %s232_s12  ;;  %p236_p2 = scmp.lt.u32.totalorder %s232_s12, %s368_s5 }
  0xec   :  { %p238_p3 = pnand %p236_p2, %p233_p1 }
  0xee   :  { %241 = shalt.err (!%p238_p3)
}
  0xef   :  { %135 = dma.vmem_to_hbm [thread:$0]  %s130_s10, 256, %s368_s5, [#allocation4], %s250_s30, %s250_s30, %s251_s6  }
  0xf0   :  { %246 = dma.done.wait [#allocation4], 256  }
  0xf1   :  { %247 = vsyncadd [#allocation4], 4294967040 }
  0xf2   :  { %139 = vsyncpa [#allocation3], 1 }
  0xf3   :  { %140 = vsyncpa [#allocation6], 1 }
  0xf4   :  { %141 = vsyncpa [#allocation4], 1 }

</bundles_post_ra>
